<compile_context>
chip_gen: v6e
topology: v6e:2x2x1
jax: 0.10.0
libtpu: 0.0.40
codegen_flags: <defaults>
</compile_context>

<pallas_src>
import jax
import jax.numpy as jnp
import numpy as np
from jax.experimental import pallas as pl
from jax.experimental.pallas import tpu as pltpu


def _round_up(x, m):
    return ((x + m - 1) // m) * m


def _split_head_kernel(x_ref, w_ref, b_ref, o_ref):
    # x_ref: (TB, HW, C)  channels-last feature block (input dtype preserved)
    # w_ref: (C, Np)      fused [actor | action | zero-pad] weight, f32
    # b_ref: (1, Np)      fused bias, f32
    # o_ref: (TB, Np)     fused lane-dense output, f32
    hw = x_ref.shape[1]
    # Spatial sum with f32 accumulation; scale once on the small pooled tensor.
    fc = jnp.sum(x_ref[...], axis=1, dtype=jnp.float32) * jnp.float32(1.0 / hw)  # (TB, C)
    out = jnp.dot(fc, w_ref[...], preferred_element_type=jnp.float32)            # MXU
    o_ref[...] = (out + b_ref[...]).astype(o_ref.dtype)


def _pick_batch_tile(batch, hw, c, itemsize, target_bytes=8 * 1024 * 1024):
    """Largest batch tile whose (padded) input block stays within ~target_bytes."""
    per_elem = _round_up(hw, 8) * _round_up(c, 128) * itemsize
    tb = max(1, min(batch, target_bytes // max(per_elem, 1), 64))
    if batch >= 8 and tb >= 8:
        tb = (tb // 8) * 8          # keep sublane-friendly tiles when batch allows
    return int(tb)


def split_classifier_forward(features, w_actor, b_actor, w_action, b_action,
                             *, channels_last=False):
    """Fused adaptive-avg-pool + dual linear heads.

    features: (B, C, H, W) NCHW (PyTorch parity) or, with channels_last=True,
              (B, H, W, C) / (B, H*W, C) to skip the layout transpose entirely.
    w_actor:  (actor_num, C)   torch Linear weight layout
    b_actor:  (actor_num,)
    w_action: (action_num, C)
    b_action: (action_num,)
    Returns (actor_out, action_out): (B, actor_num), (B, action_num), float32.
    """
    if channels_last:
        if features.ndim == 4:
            B, H, W, C = features.shape
            x = features.reshape(B, H * W, C)      # free reshape, no data movement
        else:
            B, _, C = features.shape
            x = features
    else:
        B, C, H, W = features.shape
        # Layout glue in XLA (one extra HBM pass).  Prefer channels_last=True.
        x = jnp.transpose(features, (0, 2, 3, 1)).reshape(B, H * W, C)

    HW = x.shape[1]
    A = w_actor.shape[0]
    K = w_action.shape[0]
    Np = max(128, _round_up(A + K, 128))           # lane-dense fused output width

    # Fuse the two heads: (C, Np) weight and (1, Np) bias, zero-padded to 128 lanes.
    w_fused = jnp.zeros((C, Np), jnp.float32)
    w_fused = w_fused.at[:, :A].set(jnp.transpose(w_actor).astype(jnp.float32))
    w_fused = w_fused.at[:, A:A + K].set(jnp.transpose(w_action).astype(jnp.float32))
    b_fused = jnp.zeros((1, Np), jnp.float32)
    b_fused = b_fused.at[:, :A].set(b_actor.astype(jnp.float32)[None, :])
    b_fused = b_fused.at[:, A:A + K].set(b_action.astype(jnp.float32)[None, :])

    itemsize = int(jnp.dtype(x.dtype).itemsize)
    TB = _pick_batch_tile(B, HW, C, itemsize)
    grid = (pl.cdiv(B, TB),)

    # Explicit VMEM budget: double-buffered input blocks + weights/bias/output + margin.
    in_buf = 2 * TB * _round_up(HW, 8) * _round_up(C, 128) * itemsize
    w_buf = 2 * _round_up(C, 8) * Np * 4
    b_buf = 2 * 8 * Np * 4
    out_buf = 2 * _round_up(TB, 8) * Np * 4
    vmem_limit = int(1.25 * (in_buf + w_buf + b_buf + out_buf)) + (4 << 20)
    vmem_limit = min(max(vmem_limit, 16 << 20), 60 << 20)   # stay under v7x physical VMEM

    cost = pl.CostEstimate(
        flops=2 * B * C * Np + B * HW * C,
        transcendentals=0,
        bytes_accessed=B * HW * C * itemsize + C * Np * 4 + Np * 4 + B * Np * 4,
    )

    fused_out = pl.pallas_call(
        _split_head_kernel,
        out_shape=jax.ShapeDtypeStruct((B, Np), jnp.float32),
        grid_spec=pltpu.PrefetchScalarGridSpec(
            num_scalar_prefetch=0,
            grid=grid,
            in_specs=[
                pl.BlockSpec((TB, HW, C), lambda i: (i, 0, 0)),
                pl.BlockSpec((C, Np), lambda i: (0, 0)),
                pl.BlockSpec((1, Np), lambda i: (0, 0)),
            ],
            out_specs=pl.BlockSpec((TB, Np), lambda i: (i, 0)),
        ),
        compiler_params=pltpu.CompilerParams(
            dimension_semantics=("parallel",),
            vmem_limit_bytes=vmem_limit,
        ),
        cost_estimate=cost,
    )(x, w_fused, b_fused)

    actor_out = fused_out[:, :A]
    action_out = fused_out[:, A:A + K]
    return actor_out, action_out


if __name__ == "__main__":
    # Small-but-consistent shapes: the heads require 2048 input features, so the
    # "backbone output" is (B, 2048, H, W) with tiny batch/spatial.
    B, C, H, W = 2, 2048, 4, 4
    actor_num, action_num = 8, 16

    key = jax.random.PRNGKey(0)
    k_feat, k_wa, k_ba, k_wac, k_bac = jax.random.split(key, 5)

    feat = jax.random.normal(k_feat, (B, C, H, W), dtype=jnp.float32)

    # Deterministic parameter init mimicking torch.nn.Linear (uniform +-1/sqrt(fan_in)).
    bound = 1.0 / np.sqrt(C)
    w_actor = jax.random.uniform(k_wa, (actor_num, C), minval=-bound, maxval=bound,
                                 dtype=jnp.float32)
    b_actor = jax.random.uniform(k_ba, (actor_num,), minval=-bound, maxval=bound,
                                 dtype=jnp.float32)
    w_action = jax.random.uniform(k_wac, (action_num, C), minval=-bound, maxval=bound,
                                  dtype=jnp.float32)
    b_action = jax.random.uniform(k_bac, (action_num,), minval=-bound, maxval=bound,
                                  dtype=jnp.float32)

    # NCHW path (PyTorch parity).
    actor_out, action_out = jax.block_until_ready(
        split_classifier_forward(feat, w_actor, b_actor, w_action, b_action)
    )

    # Channels-last fast path (no wrapper-side transpose) must agree.
    feat_cl = jnp.transpose(feat, (0, 2, 3, 1))
    actor_cl, action_cl = jax.block_until_ready(
        split_classifier_forward(feat_cl, w_actor, b_actor, w_action, b_action,
                                 channels_last=True)
    )

    # Pure-JAX reference check.
    fc_ref = jnp.mean(feat, axis=(2, 3))                       # (B, C)
    actor_ref = fc_ref @ w_actor.T + b_actor
    action_ref = fc_ref @ w_action.T + b_action

    assert actor_out.shape == (B, actor_num)
    assert action_out.shape == (B, action_num)
    np.testing.assert_allclose(np.asarray(actor_out), np.asarray(actor_ref),
                               rtol=1e-5, atol=1e-5)
    np.testing.assert_allclose(np.asarray(action_out), np.asarray(action_ref),
                               rtol=1e-5, atol=1e-5)
    np.testing.assert_allclose(np.asarray(actor_cl), np.asarray(actor_out),
                               rtol=1e-6, atol=1e-6)
    np.testing.assert_allclose(np.asarray(action_cl), np.asarray(action_out),
                               rtol=1e-6, atol=1e-6)

    print("KERNEL_OK")
</pallas_src>

<mosaic_0001>
module attributes {stable_mosaic.version = 11 : i64} {
  func.func @_split_head_kernel(%arg0: i32, %arg1: memref<2x16x2048xf32, #tpu.memory_space<vmem>>, %arg2: memref<2048x128xf32, #tpu.memory_space<vmem>>, %arg3: memref<1x128xf32, #tpu.memory_space<vmem>>, %arg4: memref<2x128xf32, #tpu.memory_space<vmem>>) attributes {dimension_semantics = [#tpu.dimension_semantics<parallel>], iteration_bounds = array<i64: 1>, scalar_prefetch = 0 : i64, scratch_operands = 0 : i64, tpu.core_type = #tpu.core_type<tc>, window_params = [{transform_indices = @transform_0, window_bounds = array<i64: 2, 16, 2048>}, {pipeline_mode = #tpu.pipeline_mode<synchronous>, transform_indices = @transform_1, window_bounds = array<i64: 2048, 128>}, {pipeline_mode = #tpu.pipeline_mode<synchronous>, transform_indices = @transform_2, window_bounds = array<i64: 1, 128>}, {transform_indices = @transform_3, window_bounds = array<i64: 2, 128>}]} {
    %c0 = arith.constant 0 : index
    %c0_0 = arith.constant 0 : index
    %c0_1 = arith.constant 0 : index
    %0 = vector.load %arg1[%c0, %c0_0, %c0_1] : memref<2x16x2048xf32, #tpu.memory_space<vmem>>, vector<2x16x2048xf32>
    %cst = arith.constant dense<0.000000e+00> : vector<2x2048xf32>
    %1 = vector.multi_reduction <add>, %0, %cst [1] : vector<2x16x2048xf32> to vector<2x2048xf32>
    %cst_2 = arith.constant 6.250000e-02 : f32
    %2 = vector.broadcast %cst_2 : f32 to vector<2x2048xf32>
    %3 = arith.mulf %1, %2 : vector<2x2048xf32>
    %c0_3 = arith.constant 0 : index
    %c0_4 = arith.constant 0 : index
    %4 = vector.load %arg2[%c0_3, %c0_4] : memref<2048x128xf32, #tpu.memory_space<vmem>>, vector<2048x128xf32>
    %cst_5 = arith.constant dense<0.000000e+00> : vector<2x128xf32>
    %5 = tpu.matmul %3, %4, %cst_5 {dimension_numbers = #tpu.dot_dimension_numbers<[1], [0], [0], [1], [0, 0, 1, 1], [], []>} : vector<2x2048xf32>, vector<2048x128xf32>, vector<2x128xf32> -> vector<2x128xf32>
    %c0_6 = arith.constant 0 : index
    %c0_7 = arith.constant 0 : index
    %6 = vector.load %arg3[%c0_6, %c0_7] : memref<1x128xf32, #tpu.memory_space<vmem>>, vector<1x128xf32>
    %7 = vector.broadcast %6 : vector<1x128xf32> to vector<2x128xf32>
    %8 = arith.addf %5, %7 : vector<2x128xf32>
    %c0_8 = arith.constant 0 : index
    %c0_9 = arith.constant 0 : index
    %9 = vector.load %arg4[%c0_8, %c0_9] : memref<2x128xf32, #tpu.memory_space<vmem>>, vector<2x128xf32>
    tpu.vector_store %arg4[%c0_8, %c0_9], %8 {strides = array<i32>} : memref<2x128xf32, #tpu.memory_space<vmem>>, vector<2x128xf32>,
    return
  }
  func.func @transform_0(%arg0: i32) -> (i32, i32, i32) {
    %c0_i32 = arith.constant 0 : i32
    %c0_i32_0 = arith.constant 0 : i32
    %c0_i32_1 = arith.constant 0 : i32
    return %arg0, %c0_i32, %c0_i32_0 : i32, i32, i32
  }
  func.func @transform_1(%arg0: i32) -> (i32, i32) {
    %c0_i32 = arith.constant 0 : i32
    %c0_i32_0 = arith.constant 0 : i32
    %c0_i32_1 = arith.constant 0 : i32
    return %c0_i32, %c0_i32_0 : i32, i32
  }
  func.func @transform_2(%arg0: i32) -> (i32, i32) {
    %c0_i32 = arith.constant 0 : i32
    %c0_i32_0 = arith.constant 0 : i32
    %c0_i32_1 = arith.constant 0 : i32
    return %c0_i32, %c0_i32_0 : i32, i32
  }
  func.func @transform_3(%arg0: i32) -> (i32, i32) {
    %c0_i32 = arith.constant 0 : i32
    %c0_i32_0 = arith.constant 0 : i32
    return %arg0, %c0_i32 : i32, i32
  }
}

</mosaic_0001>

<bundles_post_ra>
// kernel: tpu_custom_call.1
= control target key start
LH: loop header
LB: loop body
LE: loop exit
PB: predicated region body
PF: predicated region fallthrough
CT: control target
= control target key end

     0   :  { %8 = vsyncpa [#allocation3], 0  ;;  %s1675_s0 = inlined_call_operand.hbm [shape: f32[2,16,2048], index: 0, kind: input, shape index: {}]   ;;  %s1676_s1 = inlined_call_operand.hbm [shape: f32[2048,128], index: 1, kind: input, shape index: {}]   ;;  %s1677_s2 = inlined_call_operand.vmem [shape: f32[1,128], index: 2, kind: input, shape index: {}]   ;;  %s1678_s3 = inlined_call_operand.hbm [shape: f32[2,128], index: 3, kind: output, shape index: {}]  }
   0x1   :  { %9 = vsyncpa [#allocation6], 0 }
   0x2   :  { %10 = vsyncpa [#allocation4], 0  ;;  %s1621_s12 = smov [#allocation2]  }
   0x3   :  { %s16_s13 = sshll.u32 %s1621_s12, 4  ;;  %s17_s13 = int_to_ptr.vmem [resolvable:$true] %s16_s13 }
   0x4   :  { %s1563_s14 = scalar_lea.vmem %s17_s13, 8192  ;;  %p1568_p1 = scmp.lt.s32.totalorder %s17_s13, %s17_s13 }
   0x5   :  { %p1564_p0 = scmp.ne.s32.totalorder %s17_s13, %s1563_s14  ;;  %p1569_p2 = scmp.lt.s32.totalorder %s1563_s14, %s1563_s14 }
   0x7   :  { %p1570_p3 = por %p1569_p2, %p1568_p1 }
   0x9   :  { %p1571_p4 = pnand %p1570_p3, %p1564_p0 }
   0xb   :  { %1574 = shalt.err (!%p1571_p4)
}
   0xc   :  { %s1622_s15 = smov 2048   ;;  %s1623_s16 = smov 128  }
   0xd   :  { %22 = dma.hbm_to_vmem [thread:$0]  %s1675_s0, 8192, %s17_s13, [#allocation3], %s1622_s15, %s1622_s15, %s1623_s16  }
   0xe   :  { %s1624_s19 = smov [#allocation5]  }
   0xf   :  { %s28_s20 = sshll.u32 %s1624_s19, 4  ;;  %s29_s20 = int_to_ptr.vmem [resolvable:$true] %s28_s20 }
  0x10   :  { %s1583_s21 = scalar_lea.vmem %s29_s20, 32768  ;;  %p1588_p6 = scmp.lt.s32.totalorder %s29_s20, %s29_s20 }
  0x11   :  { %p1584_p5 = scmp.ne.s32.totalorder %s29_s20, %s1583_s21  ;;  %p1589_p7 = scmp.lt.s32.totalorder %s1583_s21, %s1583_s21 }
  0x13   :  { %p1590_p8 = por %p1589_p7, %p1588_p6 }
  0x15   :  { %p1591_p9 = pnand %p1590_p8, %p1584_p5 }
  0x17   :  { %1594 = shalt.err (!%p1591_p9)
}
  0x18   :  { %s1625_s22 = smov 8  }
  0x19   :  { %34 = dma.hbm_to_vmem [thread:$0]  %s1676_s1, 32768, %s29_s20, [#allocation6], %s1623_s16, %s1623_s16, %s1625_s22  }
  0x1a   :  { %1615 = dma.done.wait [#allocation3], 8192  }
  0x1b   :  { %1616 = vsyncadd [#allocation3], 4294959104 }
  0x1c   :  { %1617 = dma.done.wait [#allocation6], 32768  }
  0x1d   :  { %1618 = vsyncadd [#allocation6], 4294934528  ;;  %v394_v0 = vld [vmem:[#allocation5 + $0xf8] sm:$0xff]  ;;  %v393_v4 = vld [vmem:[#allocation5 + $0xf0] sm:$0xff]  ;;  %vm658_vm0 = vcmask 1041409  }
  0x1e   :  { %v426_v1 = vld [vmem:[#allocation5 + $0x1f8] sm:$0xff]  ;;  %1269 = vmatprep.subr.mxu0 %v394_v0  ;;  %v425_v5 = vld [vmem:[#allocation5 + $0x1f0] sm:$0xff]  ;;  %v392_v8 = vld [vmem:[#allocation5 + $0xe8] sm:$0xff] }
  0x1f   :  { %v378_v2 = vld [vmem:[#allocation5 + $0x78] sm:$0xff]  ;;  %1304 = vmatprep.subr.mxu1 %v426_v1  ;;  %v377_v6 = vld [vmem:[#allocation5 + $0x70] sm:$0xff]  ;;  %v424_v9 = vld [vmem:[#allocation5 + $0x1e8] sm:$0xff] }
  0x20   :  { %v410_v3 = vld [vmem:[#allocation5 + $0x178] sm:$0xff]  ;;  %1270 = vmatpush3.msra.mxu0 %v378_v2  ;;  %v409_v7 = vld [vmem:[#allocation5 + $0x170] sm:$0xff]  ;;  %v376_v10 = vld [vmem:[#allocation5 + $0x68] sm:$0xff] }
  0x21   :  { %1305 = vmatpush3.msra.mxu1 %v410_v3  ;;  %1271 = vmatprep.subr.mxu0 %v393_v4  ;;  %v408_v11 = vld [vmem:[#allocation5 + $0x168] sm:$0xff]  ;;  %v391_v12 = vld [vmem:[#allocation5 + $0xe0] sm:$0xff]  ;;  %v390_v16 = vld [vmem:[#allocation5 + $0xd8] sm:$0xff] }
  0x22   :  { %1306 = vmatprep.subr.mxu1 %v425_v5  ;;  %1272 = vmatpush3.msra.mxu0 %v377_v6  ;;  %v423_v13 = vld [vmem:[#allocation5 + $0x1e0] sm:$0xff]  ;;  %v422_v17 = vld [vmem:[#allocation5 + $0x1d8] sm:$0xff]  ;;  %v389_v20 = vld [vmem:[#allocation5 + $0xd0] sm:$0xff] }
  0x23   :  { %1307 = vmatpush3.msra.mxu1 %v409_v7  ;;  %1273 = vmatprep.subr.mxu0 %v392_v8  ;;  %v375_v14 = vld [vmem:[#allocation5 + $0x60] sm:$0xff]  ;;  %v374_v18 = vld [vmem:[#allocation5 + $0x58] sm:$0xff]  ;;  %v421_v21 = vld [vmem:[#allocation5 + $0x1d0] sm:$0xff] }
  0x24   :  { %1308 = vmatprep.subr.mxu1 %v424_v9  ;;  %v407_v15 = vld [vmem:[#allocation5 + $0x160] sm:$0xff]  ;;  %1274 = vmatpush3.msra.mxu0 %v376_v10  ;;  %v406_v19 = vld [vmem:[#allocation5 + $0x158] sm:$0xff]  ;;  %v373_v22 = vld [vmem:[#allocation5 + $0x50] sm:$0xff] }
  0x25   :  { %1309 = vmatpush3.msra.mxu1 %v408_v11  ;;  %1275 = vmatprep.subr.mxu0 %v391_v12  ;;  %v405_v23 = vld [vmem:[#allocation5 + $0x150] sm:$0xff]  ;;  %v388_v24 = vld [vmem:[#allocation5 + $0xc8] sm:$0xff]  ;;  %v387_v28 = vld [vmem:[#allocation5 + $0xc0] sm:$0xff] }
  0x26   :  { %1310 = vmatprep.subr.mxu1 %v423_v13  ;;  %1276 = vmatpush3.msra.mxu0 %v375_v14  ;;  %v420_v25 = vld [vmem:[#allocation5 + $0x1c8] sm:$0xff]  ;;  %v419_v29 = vld [vmem:[#allocation5 + $0x1c0] sm:$0xff]  ;;  %v386_v32 = vld [vmem:[#allocation5 + $0xb8] sm:$0xff] }
  0x27   :  { %1311 = vmatpush3.msra.mxu1 %v407_v15  ;;  %1277 = vmatprep.subr.mxu0 %v390_v16  ;;  %v372_v26 = vld [vmem:[#allocation5 + $0x48] sm:$0xff]  ;;  %v371_v30 = vld [vmem:[#allocation5 + $0x40] sm:$0xff]  ;;  %v418_v33 = vld [vmem:[#allocation5 + $0x1b8] sm:$0xff] }
  0x28   :  { %1312 = vmatprep.subr.mxu1 %v422_v17  ;;  %1278 = vmatpush3.msra.mxu0 %v374_v18  ;;  %v404_v27 = vld [vmem:[#allocation5 + $0x148] sm:$0xff]  ;;  %v403_v31 = vld [vmem:[#allocation5 + $0x140] sm:$0xff]  ;;  %v370_v34 = vld [vmem:[#allocation5 + $0x38] sm:$0xff] }
  0x29   :  { %1313 = vmatpush3.msra.mxu1 %v406_v19  ;;  %1279 = vmatprep.subr.mxu0 %v389_v20  ;;  %v402_v35 = vld [vmem:[#allocation5 + $0x138] sm:$0xff]  ;;  %v385_v36 = vld [vmem:[#allocation5 + $0xb0] sm:$0xff]  ;;  %v384_v40 = vld [vmem:[#allocation5 + $0xa8] sm:$0xff] }
  0x2a   :  { %1314 = vmatprep.subr.mxu1 %v421_v21  ;;  %1280 = vmatpush3.msra.mxu0 %v373_v22  ;;  %v417_v37 = vld [vmem:[#allocation5 + $0x1b0] sm:$0xff]  ;;  %v416_v41 = vld [vmem:[#allocation5 + $0x1a8] sm:$0xff]  ;;  %v383_v44 = vld [vmem:[#allocation5 + $0xa0] sm:$0xff] }
  0x2b   :  { %1315 = vmatpush3.msra.mxu1 %v405_v23  ;;  %1281 = vmatprep.subr.mxu0 %v388_v24  ;;  %v369_v38 = vld [vmem:[#allocation5 + $0x30] sm:$0xff]  ;;  %v368_v42 = vld [vmem:[#allocation5 + $0x28] sm:$0xff]  ;;  %v415_v45 = vld [vmem:[#allocation5 + $0x1a0] sm:$0xff] }
  0x2c   :  { %1316 = vmatprep.subr.mxu1 %v420_v25  ;;  %1282 = vmatpush3.msra.mxu0 %v372_v26  ;;  %v401_v39 = vld [vmem:[#allocation5 + $0x130] sm:$0xff]  ;;  %v400_v43 = vld [vmem:[#allocation5 + $0x128] sm:$0xff]  ;;  %v367_v46 = vld [vmem:[#allocation5 + $0x20] sm:$0xff] }
  0x2d   :  { %1317 = vmatpush3.msra.mxu1 %v404_v27  ;;  %1283 = vmatprep.subr.mxu0 %v387_v28  ;;  %v399_v47 = vld [vmem:[#allocation5 + $0x120] sm:$0xff]  ;;  %v382_v48 = vld [vmem:[#allocation5 + $0x98] sm:$0xff]  ;;  %v44_v52 = vld [vmem:[#allocation2 + $0x8] sm:$0xff] }
  0x2e   :  { %1318 = vmatprep.subr.mxu1 %v419_v29  ;;  %1284 = vmatpush3.msra.mxu0 %v371_v30  ;;  %v414_v49 = vld [vmem:[#allocation5 + $0x198] sm:$0xff]  ;;  %v60_v53 = vld [vmem:[#allocation2 + $0x88] sm:$0xff]  ;;  %v381_v55 = vld [vmem:[#allocation5 + $0x90] sm:$0xff] }
  0x2f   :  { %1319 = vmatpush3.msra.mxu1 %v403_v31  ;;  %1285 = vmatprep.subr.mxu0 %v386_v32  ;;  %v366_v50 = vld [vmem:[#allocation5 + $0x18] sm:$0xff]  ;;  %v76_v54 = vld [vmem:[#allocation2 + $0x108] sm:$0xff]  ;;  %v413_v56 = vld [vmem:[#allocation5 + $0x190] sm:$0xff]  ;;  %v114_v58 = vadd.f32 %v60_v53, %v44_v52 }
  0x30   :  { %1320 = vmatprep.subr.mxu1 %v418_v33  ;;  %1286 = vmatpush3.msra.mxu0 %v370_v34  ;;  %v398_v51 = vld [vmem:[#allocation5 + $0x118] sm:$0xff]  ;;  %v92_v57 = vld [vmem:[#allocation2 + $0x188] sm:$0xff]  ;;  %v43_v59 = vld [vmem:[#allocation2] sm:$0xff] }
  0x31   :  { %1321 = vmatpush3.msra.mxu1 %v402_v35  ;;  %1287 = vmatprep.subr.mxu0 %v385_v36  ;;  %v365_v60 = vld [vmem:[#allocation5 + $0x10] sm:$0xff]  ;;  %v226_v62 = vadd.f32 %v92_v57, %v76_v54  ;;  %v59_v63 = vld [vmem:[#allocation2 + $0x80] sm:$0xff]  ;;  %v115_v2 = vrot.slane %v114_v58, 4  ;;  %v46_v5 = vld [vmem:[#allocation2 + $0x18] sm:$0xff] }
  0x32   :  { %1322 = vmatprep.subr.mxu1 %v417_v37  ;;  %1288 = vmatpush3.msra.mxu0 %v369_v38  ;;  %v397_v61 = vld [vmem:[#allocation5 + $0x110] sm:$0xff]  ;;  %v75_v0 = vld [vmem:[#allocation2 + $0x100] sm:$0xff]  ;;  %v107_v3 = vadd.f32 %v59_v63, %v43_v59  ;;  %v62_v6 = vld [vmem:[#allocation2 + $0x98] sm:$0xff] }
  0x33   :  { %1323 = vmatpush3.msra.mxu1 %v401_v39  ;;  %1289 = vmatprep.subr.mxu0 %v384_v40  ;;  %v91_v1 = vld [vmem:[#allocation2 + $0x180] sm:$0xff]  ;;  %v78_v7 = vld [vmem:[#allocation2 + $0x118] sm:$0xff]  ;;  %v380_v8 = vld [vmem:[#allocation5 + $0x88] sm:$0xff]  ;;  %v227_v10 = vrot.slane %v226_v62, 4  ;;  %v128_v12 = vadd.f32 %v62_v6, %v46_v5  ;;  %v116_v13 = vadd.f32 %v115_v2, %v114_v58 }
  0x34   :  { %1324 = vmatprep.subr.mxu1 %v416_v41  ;;  %1290 = vmatpush3.msra.mxu0 %v368_v42  ;;  %v219_v4 = vadd.f32 %v91_v1, %v75_v0  ;;  %v412_v9 = vld [vmem:[#allocation5 + $0x188] sm:$0xff]  ;;  %v94_v11 = vld [vmem:[#allocation2 + $0x198] sm:$0xff]  ;;  %v108_v14 = vrot.slane %v107_v3, 4  ;;  %v45_v17 = vld [vmem:[#allocation2 + $0x10] sm:$0xff] }
  0x35   :  { %1325 = vmatpush3.msra.mxu1 %v400_v43  ;;  %1291 = vmatprep.subr.mxu0 %v383_v44  ;;  %v240_v16 = vadd.f32 %v94_v11, %v78_v7  ;;  %v61_v18 = vld [vmem:[#allocation2 + $0x90] sm:$0xff]  ;;  %v364_v20 = vld [vmem:[#allocation5 + $0x8] sm:$0xff]  ;;  %v228_v22 = vadd.f32 %v227_v10, %v226_v62  ;;  %v129_v23 = vrot.slane %v128_v12, 4  ;;  %v379_v26 = vld [vmem:[#allocation5 + $0x80] sm:$0xff]  ;;  %v117_v28 = vrot.slane %v116_v13, 2 }
  0x36   :  { %1326 = vmatprep.subr.mxu1 %v415_v45  ;;  %1292 = vmatpush3.msra.mxu0 %v367_v46  ;;  %v220_v15 = vrot.slane %v219_v4, 4  ;;  %v77_v19 = vld [vmem:[#allocation2 + $0x110] sm:$0xff]  ;;  %v396_v21 = vld [vmem:[#allocation5 + $0x108] sm:$0xff]  ;;  %v121_v25 = vadd.f32 %v61_v18, %v45_v17  ;;  %v411_v27 = vld [vmem:[#allocation5 + $0x180] sm:$0xff]  ;;  %v109_v29 = vadd.f32 %v108_v14, %v107_v3 }
  0x37   :  { %1327 = vmatpush3.msra.mxu1 %v399_v47  ;;  %1293 = vmatprep.subr.mxu0 %v382_v48  ;;  %v93_v24 = vld [vmem:[#allocation2 + $0x190] sm:$0xff]  ;;  %v241_v31 = vrot.slane %v240_v16, 4  ;;  %v363_v32 = vld [vmem:[#allocation5] sm:$0xff]  ;;  %v229_v33 = vrot.slane %v228_v22, 2  ;;  %v130_v35 = vadd.f32 %v129_v23, %v128_v12  ;;  %v118_v38 = vadd.f32 %v117_v28, %v116_v13  ;;  %v458_v42 = vld [vmem:[#allocation5 + $0x2f8] sm:$0xff] }
  0x38   :  { %1328 = vmatprep.subr.mxu1 %v414_v49  ;;  %1294 = vmatpush3.msra.mxu0 %v366_v50  ;;  %v221_v30 = vadd.f32 %v220_v15, %v219_v4  ;;  %v395_v34 = vld [vmem:[#allocation5 + $0x100] sm:$0xff]  ;;  %v122_v36 = vrot.slane %v121_v25, 4  ;;  %v233_v37 = vadd.f32 %v93_v24, %v77_v19  ;;  %v110_v39 = vrot.slane %v109_v29, 2  ;;  %v490_v43 = vld [vmem:[#allocation5 + $0x3f8] sm:$0xff]  ;;  %v457_v18 = vld [vmem:[#allocation5 + $0x2f0] sm:$0xff] }
  0x39   :  { %1329 = vmatpush3.msra.mxu1 %v398_v51  ;;  %1295 = vmatprep.subr.mxu0 %v381_v55  ;;  %v242_v41 = vadd.f32 %v241_v31, %v240_v16  ;;  %v230_v44 = vadd.f32 %v229_v33, %v228_v22  ;;  %v131_v45 = vrot.slane %v130_v35, 2  ;;  %v119_v48 = vrot.slane %v118_v38, 1  ;;  %v442_v15 = vld [vmem:[#allocation5 + $0x278] sm:$0xff]  ;;  %v456_v23 = vld [vmem:[#allocation5 + $0x2e8] sm:$0xff]  ;;  %v455_v28 = vld [vmem:[#allocation5 + $0x2e0] sm:$0xff] }
  0x3a   :  { %1330 = vmatprep.subr.mxu1 %v413_v56  ;;  %1296 = vmatpush3.msra.mxu0 %v365_v60  ;;  %v222_v40 = vrot.slane %v221_v30, 2  ;;  %v123_v46 = vadd.f32 %v122_v36, %v121_v25  ;;  %v234_v47 = vrot.slane %v233_v37, 4  ;;  %v111_v49 = vadd.f32 %v110_v39, %v109_v29  ;;  %v440_v25 = vld [vmem:[#allocation5 + $0x268] sm:$0xff]  ;;  %v487_v36 = vld [vmem:[#allocation5 + $0x3e0] sm:$0xff] }
  0x3b   :  { %1331 = vmatpush3.msra.mxu1 %v397_v61  ;;  %1297 = vmatprep.subr.mxu0 %v380_v8  ;;  %v243_v51 = vrot.slane %v242_v41, 2  ;;  %v231_v52 = vrot.slane %v230_v44, 1  ;;  %v132_v53 = vadd.f32 %v131_v45, %v130_v35  ;;  %v120_v56 = vadd.f32 %v119_v48, %v118_v38  ;;  %v488_v31 = vld [vmem:[#allocation5 + $0x3e8] sm:$0xff]  ;;  %v438_v35 = vld [vmem:[#allocation5 + $0x258] sm:$0xff]  ;;  %v437_v38 = vld [vmem:[#allocation5 + $0x250] sm:$0xff] }
  0x3c   :  { %1332 = vmatprep.subr.mxu1 %v412_v9  ;;  %1298 = vmatpush3.msra.mxu0 %v364_v20  ;;  %v223_v50 = vadd.f32 %v222_v40, %v221_v30  ;;  %v124_v54 = vrot.slane %v123_v46, 2  ;;  %v235_v55 = vadd.f32 %v234_v47, %v233_v37  ;;  %v112_v57 = vrot.slane %v111_v49, 1  ;;  %v473_v30 = vld [vmem:[#allocation5 + $0x370] sm:$0xff]  ;;  %v472_v33 = vld [vmem:[#allocation5 + $0x368] sm:$0xff]  ;;  %v471_v40 = vld [vmem:[#allocation5 + $0x360] sm:$0xff] }
  0x3d   :  { %1333 = vmatpush3.msra.mxu1 %v396_v21  ;;  %1299 = vmatprep.subr.mxu0 %v379_v26  ;;  %v244_v59 = vadd.f32 %v243_v51, %v242_v41  ;;  %v232_v60 = vadd.f32 %v231_v52, %v230_v44  ;;  %v133_v61 = vrot.slane %v132_v53, 1  ;;  %v332_v0 = vmul.f32 0.0625, %v120_v56  ;;  %v441_v21 = vld [vmem:[#allocation5 + $0x270] sm:$0xff]  ;;  %v474_v26 = vld [vmem:[#allocation5 + $0x378] sm:$0xff]  ;;  %v48_v39 = vld [vmem:[#allocation2 + $0x28] sm:$0xff] }
  0x3e   :  { %1334 = vmatprep.subr.mxu1 %v411_v27  ;;  %1300 = vmatpush3.msra.mxu0 %v363_v32  ;;  %v224_v58 = vrot.slane %v223_v50, 1  ;;  %v125_v62 = vadd.f32 %v124_v54, %v123_v46  ;;  %v236_v63 = vrot.slane %v235_v55, 2  ;;  %v113_v1 = vadd.f32 %v112_v57, %v111_v49  ;;  %v489_v27 = vld [vmem:[#allocation5 + $0x3f0] sm:$0xff]  ;;  %v439_v32 = vld [vmem:[#allocation5 + $0x260] sm:$0xff]  ;;  %v452_v41 = vld [vmem:[#allocation5 + $0x2c8] sm:$0xff] }
  0x3f   :  { %1335 = vmatpush3.msra.mxu1 %v395_v34  ;;  %1339 = vmatprep.subr.mxu0 %v458_v42  ;;  %v245_v3 = vrot.slane %v244_v59, 1  ;;  %v348_v4 = vmul.f32 0.0625, %v232_v60  ;;  %v134_v5 = vadd.f32 %v133_v61, %v132_v53  ;;  %v454_v34 = vld [vmem:[#allocation5 + $0x2d8] sm:$0xff]  ;;  %v453_v37 = vld [vmem:[#allocation5 + $0x2d0] sm:$0xff]  ;;  %v64_v42 = vld [vmem:[#allocation2 + $0xa8] sm:$0xff] }
  0x40   :  { %1374 = vmatprep.subr.mxu1 %v490_v43  ;;  %v225_v2 = vadd.f32 %v224_v58, %v223_v50  ;;  %v126_v6 = vrot.slane %v125_v62, 1  ;;  %v237_v7 = vadd.f32 %v236_v63, %v235_v55  ;;  %v331_v8 = vmul.f32 0.0625, %v113_v1  ;;  %v80_v43 = vld [vmem:[#allocation2 + $0x128] sm:$0xff]  ;;  %v486_v45 = vld [vmem:[#allocation5 + $0x3d8] sm:$0xff]  ;;  %v47_v49 = vld [vmem:[#allocation2 + $0x20] sm:$0xff] }
  0x41   :  { %v246_v10 = vadd.f32 %v245_v3, %v244_v59  ;;  %v660_v11 = vsel %vm658_vm0, %v348_v4, %v332_v0  ;;  %v334_v12 = vmul.f32 0.0625, %v134_v5  ;;  %v96_v44 = vld [vmem:[#allocation2 + $0x1a8] sm:$0xff]  ;;  %v142_v47 = vadd.f32 %v64_v42, %v48_v39  ;;  %v63_v50 = vld [vmem:[#allocation2 + $0xa0] sm:$0xff]  ;;  %v470_v51 = vld [vmem:[#allocation5 + $0x358] sm:$0xff] }
  0x42   :  { %v347_v9 = vmul.f32 0.0625, %v225_v2  ;;  %v127_v13 = vadd.f32 %v126_v6, %v125_v62  ;;  %v238_v14 = vrot.slane %v237_v7, 1  ;;  %755 = vmatprep.mubr.f32.mxu0 %v660_v11  ;;  %v436_v46 = vld [vmem:[#allocation5 + $0x248] sm:$0xff]  ;;  %v254_v48 = vadd.f32 %v96_v44, %v80_v43  ;;  %v79_v52 = vld [vmem:[#allocation2 + $0x120] sm:$0xff]  ;;  %v50_v55 = vld [vmem:[#allocation2 + $0x38] sm:$0xff] }
  0x43   :  { %v350_v17 = vmul.f32 0.0625, %v246_v10  ;;  %v95_v53 = vld [vmem:[#allocation2 + $0x1a0] sm:$0xff]  ;;  %v135_v54 = vadd.f32 %v63_v50, %v47_v49  ;;  %v485_v56 = vld [vmem:[#allocation5 + $0x3d0] sm:$0xff]  ;;  %v143_v57 = vrot.slane %v142_v47, 4  ;;  %v66_v60 = vld [vmem:[#allocation2 + $0xb8] sm:$0xff] }
  0x44   :  { %v659_v16 = vsel %vm658_vm0, %v347_v9, %v331_v8  ;;  %v239_v19 = vadd.f32 %v238_v14, %v237_v7  ;;  %v333_v20 = vmul.f32 0.0625, %v127_v13  ;;  %v255_v58 = vrot.slane %v254_v48, 4  ;;  %v82_v61 = vld [vmem:[#allocation2 + $0x138] sm:$0xff]  ;;  %v451_v63 = vld [vmem:[#allocation5 + $0x2c0] sm:$0xff]  ;;  %v49_v4 = vld [vmem:[#allocation2 + $0x30] sm:$0xff] }
  0x45   :  { %756 = vmatmul.mubr.f32.vlgmr.msra.gmra.mxu0 %v659_v16  ;;  %v662_v22 = vsel %vm658_vm0, %v350_v17, %v334_v12  ;;  %v247_v59 = vadd.f32 %v95_v53, %v79_v52  ;;  %v98_v62 = vld [vmem:[#allocation2 + $0x1b8] sm:$0xff]  ;;  %v435_v0 = vld [vmem:[#allocation5 + $0x240] sm:$0xff]  ;;  %v136_v1 = vrot.slane %v135_v54, 4  ;;  %v156_v2 = vadd.f32 %v66_v60, %v50_v55  ;;  %v65_v8 = vld [vmem:[#allocation2 + $0xb0] sm:$0xff] }
  0x46   :  { %1340 = vmatpush3.msra.mxu0 %v442_v15  ;;  %825 = vmatprep.mubr.f32.mxu1 %v662_v22  ;;  %v349_v24 = vmul.f32 0.0625, %v239_v19  ;;  %v268_v3 = vadd.f32 %v98_v62, %v82_v61  ;;  %v144_v5 = vadd.f32 %v143_v57, %v142_v47  ;;  %v256_v6 = vadd.f32 %v255_v58, %v254_v48  ;;  %v81_v9 = vld [vmem:[#allocation2 + $0x130] sm:$0xff]  ;;  %v450_v12 = vld [vmem:[#allocation5 + $0x2b8] sm:$0xff]  ;;  %v484_v17 = vld [vmem:[#allocation5 + $0x3c8] sm:$0xff] }
  0x47   :  { %1341 = vmatprep.subr.mxu0 %v457_v18  ;;  %v248_v7 = vrot.slane %v247_v59, 4  ;;  %v97_v10 = vld [vmem:[#allocation2 + $0x1b0] sm:$0xff]  ;;  %v137_v13 = vadd.f32 %v136_v1, %v135_v54  ;;  %v157_v14 = vrot.slane %v156_v2, 4  ;;  %v149_v16 = vadd.f32 %v65_v8, %v49_v4  ;;  %v434_v18 = vld [vmem:[#allocation5 + $0x238] sm:$0xff]  ;;  %v432_v42 = vld [vmem:[#allocation5 + $0x228] sm:$0xff] }
  0x48   :  { %1342 = vmatpush3.msra.mxu0 %v441_v21  ;;  %v661_v29 = vsel %vm658_vm0, %v349_v24, %v333_v20  ;;  %v469_v11 = vld [vmem:[#allocation5 + $0x350] sm:$0xff]  ;;  %v269_v15 = vrot.slane %v268_v3, 4  ;;  %v145_v19 = vrot.slane %v144_v5, 2  ;;  %v257_v20 = vrot.slane %v256_v6, 2  ;;  %v466_v47 = vld [vmem:[#allocation5 + $0x338] sm:$0xff]  ;;  %v447_v48 = vld [vmem:[#allocation5 + $0x2a0] sm:$0xff] }
  0x49   :  { %1343 = vmatprep.subr.mxu0 %v456_v23  ;;  %826 = vmatmul.mubr.f32.vlgmr.msra.gmra.mxu1 %v661_v29  ;;  %v249_v21 = vadd.f32 %v248_v7, %v247_v59  ;;  %v261_v22 = vadd.f32 %v97_v10, %v81_v9  ;;  %v468_v23 = vld [vmem:[#allocation5 + $0x348] sm:$0xff]  ;;  %v449_v24 = vld [vmem:[#allocation5 + $0x2b0] sm:$0xff]  ;;  %v483_v29 = vld [vmem:[#allocation5 + $0x3c0] sm:$0xff] }
  0x4a   :  { %1344 = vmatpush3.msra.mxu0 %v440_v25  ;;  %1375 = vmatpush3.msra.mxu1 %v474_v26  ;;  %v138_v25 = vrot.slane %v137_v13, 2  ;;  %v158_v26 = vadd.f32 %v157_v14, %v156_v2  ;;  %v481_v53 = vld [vmem:[#allocation5 + $0x3b0] sm:$0xff]  ;;  %v431_v54 = vld [vmem:[#allocation5 + $0x220] sm:$0xff]  ;;  %v446_v59 = vld [vmem:[#allocation5 + $0x298] sm:$0xff] }
  0x4b   :  { %1345 = vmatprep.subr.mxu0 %v455_v28  ;;  %1376 = vmatprep.subr.mxu1 %v489_v27  ;;  %v270_v27 = vadd.f32 %v269_v15, %v268_v3  ;;  %v150_v28 = vrot.slane %v149_v16, 4  ;;  %v465_v58 = vld [vmem:[#allocation5 + $0x330] sm:$0xff]  ;;  %v430_v1 = vld [vmem:[#allocation5 + $0x218] sm:$0xff]  ;;  %v479_v10 = vld [vmem:[#allocation5 + $0x3a0] sm:$0xff] }
  0x4c   :  { %1346 = vmatpush3.msra.mxu0 %v439_v32  ;;  %1377 = vmatpush3.msra.mxu1 %v473_v30  ;;  %v433_v30 = vld [vmem:[#allocation5 + $0x230] sm:$0xff]  ;;  %v258_v32 = vadd.f32 %v257_v20, %v256_v6  ;;  %v444_v14 = vld [vmem:[#allocation5 + $0x288] sm:$0xff] }
  0x4d   :  { %1347 = vmatprep.subr.mxu0 %v454_v34  ;;  %1378 = vmatprep.subr.mxu1 %v488_v31  ;;  %v146_v31 = vadd.f32 %v145_v19, %v144_v5  ;;  %v262_v34 = vrot.slane %v261_v22, 4  ;;  %v271_v39 = vrot.slane %v270_v27, 2  ;;  %v464_v5 = vld [vmem:[#allocation5 + $0x328] sm:$0xff]  ;;  %v445_v6 = vld [vmem:[#allocation5 + $0x290] sm:$0xff] }
  0x4e   :  { %1348 = vmatpush3.msra.mxu0 %v438_v35  ;;  %1379 = vmatpush3.msra.mxu1 %v472_v33  ;;  %v250_v33 = vrot.slane %v249_v21, 2  ;;  %v467_v35 = vld [vmem:[#allocation5 + $0x340] sm:$0xff]  ;;  %v259_v44 = vrot.slane %v258_v32, 1 }
  0x4f   :  { %1349 = vmatprep.subr.mxu0 %v453_v37  ;;  %1380 = vmatprep.subr.mxu1 %v487_v36  ;;  %v448_v36 = vld [vmem:[#allocation5 + $0x2a8] sm:$0xff]  ;;  %v139_v37 = vadd.f32 %v138_v25, %v137_v13  ;;  %v147_v43 = vrot.slane %v146_v31, 1  ;;  %v463_v13 = vld [vmem:[#allocation5 + $0x320] sm:$0xff] }
  0x50   :  { %1350 = vmatpush3.msra.mxu0 %v437_v38  ;;  %1381 = vmatpush3.msra.mxu1 %v471_v40  ;;  %v159_v38 = vrot.slane %v158_v26, 2  ;;  %v151_v40 = vadd.f32 %v150_v28, %v149_v16  ;;  %v260_v60 = vadd.f32 %v259_v44, %v258_v32  ;;  %v427_v28 = vld [vmem:[#allocation5 + $0x200] sm:$0xff]  ;;  %v52_v44 = vld [vmem:[#allocation2 + $0x48] sm:$0xff] }
  0x51   :  { %1351 = vmatprep.subr.mxu0 %v452_v41  ;;  %1382 = vmatprep.subr.mxu1 %v486_v45  ;;  %v482_v41 = vld [vmem:[#allocation5 + $0x3b8] sm:$0xff]  ;;  %v251_v45 = vadd.f32 %v250_v33, %v249_v21  ;;  %v140_v49 = vrot.slane %v139_v37, 1  ;;  %v148_v55 = vadd.f32 %v147_v43, %v146_v31  ;;  %v476_v31 = vld [vmem:[#allocation5 + $0x388] sm:$0xff]  ;;  %v521_v43 = vld [vmem:[#allocation5 + $0x4f0] sm:$0xff] }
  0x52   :  { %1352 = vmatpush3.msra.mxu0 %v436_v46  ;;  %1383 = vmatpush3.msra.mxu1 %v470_v51  ;;  %v263_v46 = vadd.f32 %v262_v34, %v261_v22  ;;  %v160_v50 = vadd.f32 %v159_v38, %v158_v26  ;;  %v272_v51 = vadd.f32 %v271_v39, %v270_v27  ;;  %v152_v52 = vrot.slane %v151_v40, 2  ;;  %v477_v27 = vld [vmem:[#allocation5 + $0x390] sm:$0xff]  ;;  %v522_v39 = vld [vmem:[#allocation5 + $0x4f8] sm:$0xff] }
  0x53   :  { %1353 = vmatprep.subr.mxu0 %v451_v63  ;;  %1384 = vmatprep.subr.mxu1 %v485_v56  ;;  %v252_v56 = vrot.slane %v251_v45, 1  ;;  %v141_v2 = vadd.f32 %v140_v49, %v139_v37  ;;  %v336_v15 = vmul.f32 0.0625, %v148_v55  ;;  %v352_v16 = vmul.f32 0.0625, %v260_v60  ;;  %v459_v37 = vld [vmem:[#allocation5 + $0x300] sm:$0xff]  ;;  %v84_v49 = vld [vmem:[#allocation2 + $0x148] sm:$0xff] }
  0x54   :  { %1354 = vmatpush3.msra.mxu0 %v435_v0  ;;  %1385 = vmatpush3.msra.mxu1 %v469_v11  ;;  %v264_v57 = vrot.slane %v263_v46, 2  ;;  %v161_v61 = vrot.slane %v160_v50, 1  ;;  %v273_v62 = vrot.slane %v272_v51, 1  ;;  %v153_v63 = vadd.f32 %v152_v52, %v151_v40  ;;  %v480_v0 = vld [vmem:[#allocation5 + $0x3a8] sm:$0xff]  ;;  %v429_v11 = vld [vmem:[#allocation5 + $0x210] sm:$0xff]  ;;  %v554_v40 = vld [vmem:[#allocation5 + $0x5f8] sm:$0xff] }
  0x55   :  { %1355 = vmatprep.subr.mxu0 %v450_v12  ;;  %1386 = vmatprep.subr.mxu1 %v484_v17  ;;  %v253_v3 = vadd.f32 %v252_v56, %v251_v45  ;;  %v478_v17 = vld [vmem:[#allocation5 + $0x398] sm:$0xff]  ;;  %v335_v19 = vmul.f32 0.0625, %v141_v2  ;;  %v68_v45 = vld [vmem:[#allocation2 + $0xc8] sm:$0xff]  ;;  %v537_v52 = vld [vmem:[#allocation5 + $0x570] sm:$0xff] }
  0x56   :  { %1356 = vmatpush3.msra.mxu0 %v434_v18  ;;  %1387 = vmatpush3.msra.mxu1 %v468_v23  ;;  %v265_v4 = vadd.f32 %v264_v57, %v263_v46  ;;  %v162_v7 = vadd.f32 %v161_v61, %v160_v50  ;;  %v274_v8 = vadd.f32 %v273_v62, %v272_v51  ;;  %v154_v9 = vrot.slane %v153_v63, 1  ;;  %v428_v18 = vld [vmem:[#allocation5 + $0x208] sm:$0xff]  ;;  %v462_v23 = vld [vmem:[#allocation5 + $0x318] sm:$0xff]  ;;  %v51_v55 = vld [vmem:[#allocation2 + $0x40] sm:$0xff] }
  0x57   :  { %1357 = vmatprep.subr.mxu0 %v449_v24  ;;  %1388 = vmatprep.subr.mxu1 %v483_v29  ;;  %v351_v20 = vmul.f32 0.0625, %v253_v3  ;;  %v443_v24 = vld [vmem:[#allocation5 + $0x280] sm:$0xff]  ;;  %v461_v29 = vld [vmem:[#allocation5 + $0x310] sm:$0xff]  ;;  %v100_v50 = vld [vmem:[#allocation2 + $0x1c8] sm:$0xff]  ;;  %v170_v51 = vadd.f32 %v68_v45, %v52_v44 }
  0x58   :  { %1358 = vmatpush3.msra.mxu0 %v433_v30  ;;  %1389 = vmatpush3.msra.mxu1 %v467_v35  ;;  %v266_v12 = vrot.slane %v265_v4, 1  ;;  %v155_v21 = vadd.f32 %v154_v9, %v153_v63  ;;  %v338_v25 = vmul.f32 0.0625, %v162_v7  ;;  %v354_v26 = vmul.f32 0.0625, %v274_v8  ;;  %v460_v35 = vld [vmem:[#allocation5 + $0x308] sm:$0xff]  ;;  %v67_v56 = vld [vmem:[#allocation2 + $0xc0] sm:$0xff]  ;;  %v54_v62 = vld [vmem:[#allocation2 + $0x58] sm:$0xff] }
  0x59   :  { %1359 = vmatprep.subr.mxu0 %v448_v36  ;;  %1390 = vmatprep.subr.mxu1 %v482_v41  ;;  %v664_v30 = vsel %vm658_vm0, %v352_v16, %v336_v15  ;;  %v663_v32 = vsel %vm658_vm0, %v351_v20, %v335_v19  ;;  %v475_v36 = vld [vmem:[#allocation5 + $0x380] sm:$0xff]  ;;  %v506_v41 = vld [vmem:[#allocation5 + $0x478] sm:$0xff]  ;;  %v163_v61 = vadd.f32 %v67_v56, %v51_v55  ;;  %v53_v9 = vld [vmem:[#allocation2 + $0x50] sm:$0xff] }
  0x5a   :  { %1360 = vmatpush3.msra.mxu0 %v432_v42  ;;  %1391 = vmatpush3.msra.mxu1 %v466_v47  ;;  %v267_v22 = vadd.f32 %v266_v12, %v265_v4  ;;  %v337_v33 = vmul.f32 0.0625, %v155_v21  ;;  %v666_v38 = vsel %vm658_vm0, %v354_v26, %v338_v25  ;;  %v538_v42 = vld [vmem:[#allocation5 + $0x578] sm:$0xff]  ;;  %v553_v47 = vld [vmem:[#allocation5 + $0x5f0] sm:$0xff]  ;;  %v83_v57 = vld [vmem:[#allocation2 + $0x140] sm:$0xff] }
  0x5b   :  { %1361 = vmatprep.subr.mxu0 %v447_v48  ;;  %1392 = vmatprep.subr.mxu1 %v481_v53  ;;  %v505_v48 = vld [vmem:[#allocation5 + $0x470] sm:$0xff]  ;;  %v520_v53 = vld [vmem:[#allocation5 + $0x4e8] sm:$0xff]  ;;  %v99_v60 = vld [vmem:[#allocation2 + $0x1c0] sm:$0xff]  ;;  %v164_v7 = vrot.slane %v163_v61, 4 }
  0x5c   :  { %1362 = vmatpush3.msra.mxu0 %v431_v54  ;;  %1393 = vmatpush3.msra.mxu1 %v465_v58  ;;  %v353_v34 = vmul.f32 0.0625, %v267_v22  ;;  %v282_v54 = vadd.f32 %v100_v50, %v84_v49  ;;  %v552_v58 = vld [vmem:[#allocation5 + $0x5e8] sm:$0xff]  ;;  %v70_v63 = vld [vmem:[#allocation2 + $0xd8] sm:$0xff]  ;;  %v275_v2 = vadd.f32 %v99_v60, %v83_v57  ;;  %v101_v15 = vld [vmem:[#allocation2 + $0x1d0] sm:$0xff] }
  0x5d   :  { %1363 = vmatprep.subr.mxu0 %v446_v59  ;;  %1394 = vmatprep.subr.mxu1 %v480_v0  ;;  %v171_v59 = vrot.slane %v170_v51, 4  ;;  %v504_v0 = vld [vmem:[#allocation5 + $0x468] sm:$0xff]  ;;  %v86_v3 = vld [vmem:[#allocation2 + $0x158] sm:$0xff]  ;;  %v165_v25 = vadd.f32 %v164_v7, %v163_v61  ;;  %v531_v57 = vld [vmem:[#allocation5 + $0x540] sm:$0xff] }
  0x5e   :  { %1364 = vmatpush3.msra.mxu0 %v430_v1  ;;  %1395 = vmatpush3.msra.mxu1 %v464_v5  ;;  %v665_v46 = vsel %vm658_vm0, %v353_v34, %v337_v33  ;;  %v283_v1 = vrot.slane %v282_v54, 4  ;;  %v102_v4 = vld [vmem:[#allocation2 + $0x1d8] sm:$0xff]  ;;  %v184_v5 = vadd.f32 %v70_v63, %v54_v62  ;;  %v276_v12 = vrot.slane %v275_v2, 4  ;;  %v517_v34 = vld [vmem:[#allocation5 + $0x4d0] sm:$0xff] }
  0x5f   :  { %1365 = vmatprep.subr.mxu0 %v445_v6  ;;  %1396 = vmatprep.subr.mxu1 %v479_v10  ;;  %v536_v6 = vld [vmem:[#allocation5 + $0x568] sm:$0xff]  ;;  %v296_v8 = vadd.f32 %v102_v4, %v86_v3  ;;  %v69_v10 = vld [vmem:[#allocation2 + $0xd0] sm:$0xff]  ;;  %v172_v19 = vadd.f32 %v171_v59, %v170_v51  ;;  %v534_v33 = vld [vmem:[#allocation5 + $0x558] sm:$0xff] }
  0x60   :  { %1366 = vmatpush3.msra.mxu0 %v429_v11  ;;  %1397 = vmatpush3.msra.mxu1 %v463_v13  ;;  %v519_v11 = vld [vmem:[#allocation5 + $0x4e0] sm:$0xff]  ;;  %v185_v13 = vrot.slane %v184_v5, 4  ;;  %v177_v16 = vadd.f32 %v69_v10, %v53_v9  ;;  %v284_v20 = vadd.f32 %v283_v1, %v282_v54  ;;  %v277_v26 = vadd.f32 %v276_v12, %v275_v2  ;;  %v532_v51 = vld [vmem:[#allocation5 + $0x548] sm:$0xff]  ;;  %v546_v62 = vld [vmem:[#allocation5 + $0x5b8] sm:$0xff] }
  0x61   :  { %1367 = vmatprep.subr.mxu0 %v444_v14  ;;  %1398 = vmatprep.subr.mxu1 %v478_v17  ;;  %v85_v14 = vld [vmem:[#allocation2 + $0x150] sm:$0xff]  ;;  %v551_v17 = vld [vmem:[#allocation5 + $0x5e0] sm:$0xff]  ;;  %v297_v21 = vrot.slane %v296_v8, 4  ;;  %v498_v63 = vld [vmem:[#allocation5 + $0x438] sm:$0xff] }
  0x62   :  { %1368 = vmatpush3.msra.mxu0 %v428_v18  ;;  %1399 = vmatpush3.msra.mxu1 %v462_v23  ;;  %v503_v18 = vld [vmem:[#allocation5 + $0x460] sm:$0xff]  ;;  %v289_v22 = vadd.f32 %v101_v15, %v85_v14  ;;  %v278_v44 = vrot.slane %v277_v26, 2  ;;  %v530_v3 = vld [vmem:[#allocation5 + $0x538] sm:$0xff]  ;;  %v513_v4 = vld [vmem:[#allocation5 + $0x4b0] sm:$0xff] }
  0x63   :  { %1369 = vmatprep.subr.mxu0 %v443_v24  ;;  %1400 = vmatprep.subr.mxu1 %v477_v27  ;;  %v535_v23 = vld [vmem:[#allocation5 + $0x560] sm:$0xff]  ;;  %v518_v24 = vld [vmem:[#allocation5 + $0x4d8] sm:$0xff]  ;;  %v186_v27 = vadd.f32 %v185_v13, %v184_v5  ;;  %v545_v5 = vld [vmem:[#allocation5 + $0x5b0] sm:$0xff] }
  0x64   :  { %1370 = vmatpush3.msra.mxu0 %v427_v28  ;;  %1401 = vmatpush3.msra.mxu1 %v461_v29  ;;  %v178_v28 = vrot.slane %v177_v16, 4  ;;  %v550_v29 = vld [vmem:[#allocation5 + $0x5d8] sm:$0xff]  ;;  %v499_v54 = vld [vmem:[#allocation5 + $0x440] sm:$0xff]  ;;  %v279_v60 = vadd.f32 %v278_v44, %v277_v26  ;;  %v529_v9 = vld [vmem:[#allocation5 + $0x530] sm:$0xff] }
  0x65   :  { %895 = vmatprep.mubr.f32.mxu0 %v664_v30  ;;  %1402 = vmatprep.subr.mxu1 %v476_v31  ;;  %v502_v30 = vld [vmem:[#allocation5 + $0x458] sm:$0xff]  ;;  %v298_v31 = vadd.f32 %v297_v21, %v296_v8  ;;  %v187_v45 = vrot.slane %v186_v27, 2  ;;  %v512_v10 = vld [vmem:[#allocation5 + $0x4a8] sm:$0xff]  ;;  %v543_v21 = vld [vmem:[#allocation5 + $0x5a0] sm:$0xff] }
  0x66   :  { %896 = vmatmul.mubr.f32.vlgmr.msra.gmra.mxu0 %v663_v32  ;;  %1403 = vmatpush3.msra.mxu1 %v460_v35  ;;  %v290_v32 = vrot.slane %v289_v22, 4  ;;  %v179_v35 = vadd.f32 %v178_v28, %v177_v16  ;;  %v280_v12 = vrot.slane %v279_v60, 1  ;;  %v544_v14 = vld [vmem:[#allocation5 + $0x5a8] sm:$0xff]  ;;  %v510_v26 = vld [vmem:[#allocation5 + $0x498] sm:$0xff] }
  0x67   :  { %965 = vmatprep.mubr.f32.mxu1 %v666_v38  ;;  %1404 = vmatprep.subr.mxu1 %v475_v36  ;;  %v549_v36 = vld [vmem:[#allocation5 + $0x5d0] sm:$0xff]  ;;  %v173_v38 = vrot.slane %v172_v19, 2  ;;  %v188_v61 = vadd.f32 %v187_v45, %v186_v27  ;;  %v496_v15 = vld [vmem:[#allocation5 + $0x428] sm:$0xff]  ;;  %v542_v27 = vld [vmem:[#allocation5 + $0x598] sm:$0xff] }
  0x68   :  { %1409 = vmatprep.subr.mxu0 %v522_v39  ;;  %1405 = vmatpush3.msra.mxu1 %v459_v37  ;;  %v501_v37 = vld [vmem:[#allocation5 + $0x450] sm:$0xff]  ;;  %v285_v39 = vrot.slane %v284_v20, 2  ;;  %v180_v49 = vrot.slane %v179_v35, 2  ;;  %v524_v44 = vld [vmem:[#allocation5 + $0x508] sm:$0xff]  ;;  %v507_v45 = vld [vmem:[#allocation5 + $0x480] sm:$0xff] }
  0x69   :  { %1410 = vmatpush3.msra.mxu0 %v506_v41  ;;  %1444 = vmatprep.subr.mxu1 %v554_v40  ;;  %v291_v40 = vadd.f32 %v290_v32, %v289_v22  ;;  %v533_v41 = vld [vmem:[#allocation5 + $0x550] sm:$0xff]  ;;  %v174_v55 = vadd.f32 %v173_v38, %v172_v19  ;;  %v189_v13 = vrot.slane %v188_v61, 1  ;;  %v528_v19 = vld [vmem:[#allocation5 + $0x528] sm:$0xff]  ;;  %v495_v22 = vld [vmem:[#allocation5 + $0x420] sm:$0xff] }
  0x6a   :  { %966 = vmatmul.mubr.f32.vlgmr.msra.gmra.mxu1 %v665_v46  ;;  %1411 = vmatprep.subr.mxu0 %v521_v43  ;;  %v166_v43 = vrot.slane %v165_v25, 2  ;;  %v548_v46 = vld [vmem:[#allocation5 + $0x5c8] sm:$0xff]  ;;  %v286_v56 = vadd.f32 %v285_v39, %v284_v20  ;;  %v181_v1 = vadd.f32 %v180_v49, %v179_v35  ;;  %v511_v20 = vld [vmem:[#allocation5 + $0x4a0] sm:$0xff]  ;;  %v526_v32 = vld [vmem:[#allocation5 + $0x518] sm:$0xff] }
  0x6b   :  { %1445 = vmatpush3.msra.mxu1 %v538_v42  ;;  %1412 = vmatpush3.msra.mxu0 %v505_v48  ;;  %v516_v42 = vld [vmem:[#allocation5 + $0x4c8] sm:$0xff]  ;;  %v299_v48 = vrot.slane %v298_v31, 2  ;;  %v292_v50 = vrot.slane %v291_v40, 2  ;;  %v175_v7 = vrot.slane %v174_v55, 1  ;;  %v493_v38 = vld [vmem:[#allocation5 + $0x410] sm:$0xff] }
  0x6c   :  { %1446 = vmatprep.subr.mxu1 %v553_v47  ;;  %1413 = vmatprep.subr.mxu0 %v520_v53  ;;  %v500_v47 = vld [vmem:[#allocation5 + $0x448] sm:$0xff]  ;;  %v547_v53 = vld [vmem:[#allocation5 + $0x5c0] sm:$0xff]  ;;  %v167_v59 = vadd.f32 %v166_v43, %v165_v25  ;;  %v287_v8 = vrot.slane %v286_v56, 1  ;;  %v525_v39 = vld [vmem:[#allocation5 + $0x510] sm:$0xff] }
  0x6d   :  { %1447 = vmatpush3.msra.mxu1 %v537_v52  ;;  %1414 = vmatpush3.msra.mxu0 %v504_v0  ;;  %v515_v52 = vld [vmem:[#allocation5 + $0x4c0] sm:$0xff]  ;;  %v300_v0 = vadd.f32 %v299_v48, %v298_v31  ;;  %v293_v2 = vadd.f32 %v292_v50, %v291_v40  ;;  %v494_v31 = vld [vmem:[#allocation5 + $0x418] sm:$0xff]  ;;  %v508_v40 = vld [vmem:[#allocation5 + $0x488] sm:$0xff] }
  0x6e   :  { %1448 = vmatprep.subr.mxu1 %v552_v58  ;;  %1415 = vmatprep.subr.mxu0 %v519_v11  ;;  %v514_v58 = vld [vmem:[#allocation5 + $0x4b8] sm:$0xff]  ;;  %v168_v11 = vrot.slane %v167_v59, 1  ;;  %v527_v25 = vld [vmem:[#allocation5 + $0x520] sm:$0xff] }
  0x6f   :  { %1449 = vmatpush3.msra.mxu1 %v536_v6  ;;  %1416 = vmatpush3.msra.mxu0 %v503_v18  ;;  %v497_v6 = vld [vmem:[#allocation5 + $0x430] sm:$0xff]  ;;  %v301_v16 = vrot.slane %v300_v0, 1  ;;  %v294_v18 = vrot.slane %v293_v2, 1  ;;  %v539_v50 = vld [vmem:[#allocation5 + $0x580] sm:$0xff] }
  0x70   :  { %1450 = vmatprep.subr.mxu1 %v551_v17  ;;  %1417 = vmatprep.subr.mxu0 %v518_v24  ;;  %v182_v17 = vrot.slane %v181_v1, 1  ;;  %v288_v24 = vadd.f32 %v287_v8, %v286_v56  ;;  %v169_v28 = vadd.f32 %v168_v11, %v167_v59  ;;  %v72_v56 = vld [vmem:[#allocation2 + $0xe8] sm:$0xff]  ;;  %v523_v59 = vld [vmem:[#allocation5 + $0x500] sm:$0xff]  ;;  %v105_v11 = vld [vmem:[#allocation2 + $0x1f0] sm:$0xff] }
  0x71   :  { %1451 = vmatpush3.msra.mxu1 %v535_v23  ;;  %1418 = vmatpush3.msra.mxu0 %v502_v30  ;;  %v176_v23 = vadd.f32 %v175_v7, %v174_v55  ;;  %v190_v30 = vadd.f32 %v189_v13, %v188_v61  ;;  %v56_v55 = vld [vmem:[#allocation2 + $0x68] sm:$0xff]  ;;  %v74_v61 = vld [vmem:[#allocation2 + $0xf8] sm:$0xff] }
  0x72   :  { %1452 = vmatprep.subr.mxu1 %v550_v29  ;;  %1419 = vmatprep.subr.mxu0 %v517_v34  ;;  %v281_v29 = vadd.f32 %v280_v12, %v279_v60  ;;  %v302_v34 = vadd.f32 %v301_v16, %v300_v0  ;;  %v183_v35 = vadd.f32 %v182_v17, %v181_v1  ;;  %v58_v60 = vld [vmem:[#allocation2 + $0x78] sm:$0xff]  ;;  %v55_v0 = vld [vmem:[#allocation2 + $0x60] sm:$0xff] }
  0x73   :  { %1453 = vmatpush3.msra.mxu1 %v534_v33  ;;  %1420 = vmatpush3.msra.mxu0 %v501_v37  ;;  %v509_v33 = vld [vmem:[#allocation5 + $0x490] sm:$0xff]  ;;  %v340_v43 = vmul.f32 0.0625, %v176_v23  ;;  %v342_v49 = vmul.f32 0.0625, %v190_v30  ;;  %v71_v1 = vld [vmem:[#allocation2 + $0xe0] sm:$0xff]  ;;  %v586_v12 = vld [vmem:[#allocation5 + $0x6f8] sm:$0xff]  ;;  %v212_v16 = vadd.f32 %v74_v61, %v58_v60 }
  0x74   :  { %1454 = vmatprep.subr.mxu1 %v549_v36  ;;  %1421 = vmatprep.subr.mxu0 %v516_v42  ;;  %v295_v36 = vadd.f32 %v294_v18, %v293_v2  ;;  %v541_v37 = vld [vmem:[#allocation5 + $0x590] sm:$0xff]  ;;  %v492_v42 = vld [vmem:[#allocation5 + $0x408] sm:$0xff]  ;;  %v355_v48 = vmul.f32 0.0625, %v281_v29  ;;  %v618_v13 = vld [vmem:[#allocation5 + $0x7f8] sm:$0xff] }
  0x75   :  { %1455 = vmatpush3.msra.mxu1 %v533_v41  ;;  %1422 = vmatpush3.msra.mxu0 %v500_v47  ;;  %v540_v41 = vld [vmem:[#allocation5 + $0x588] sm:$0xff]  ;;  %v339_v47 = vmul.f32 0.0625, %v169_v28  ;;  %v570_v17 = vld [vmem:[#allocation5 + $0x678] sm:$0xff] }
  0x76   :  { %1456 = vmatprep.subr.mxu1 %v548_v46  ;;  %1423 = vmatprep.subr.mxu0 %v515_v52  ;;  %v356_v46 = vmul.f32 0.0625, %v288_v24  ;;  %v358_v52 = vmul.f32 0.0625, %v302_v34  ;;  %v584_v28 = vld [vmem:[#allocation5 + $0x6e8] sm:$0xff] }
  0x77   :  { %1457 = vmatpush3.msra.mxu1 %v532_v51  ;;  %1424 = vmatpush3.msra.mxu0 %v499_v54  ;;  %v491_v51 = vld [vmem:[#allocation5 + $0x400] sm:$0xff]  ;;  %v357_v54 = vmul.f32 0.0625, %v295_v36  ;;  %v580_v60 = vld [vmem:[#allocation5 + $0x6c8] sm:$0xff] }
  0x78   :  { %1458 = vmatprep.subr.mxu1 %v547_v53  ;;  %1425 = vmatprep.subr.mxu0 %v514_v58  ;;  %v341_v53 = vmul.f32 0.0625, %v183_v35  ;;  %v104_v58 = vld [vmem:[#allocation2 + $0x1e8] sm:$0xff]  ;;  %v668_v2 = vsel %vm658_vm0, %v356_v46, %v340_v43  ;;  %v670_v7 = vsel %vm658_vm0, %v358_v52, %v342_v49  ;;  %v599_v43 = vld [vmem:[#allocation5 + $0x760] sm:$0xff]  ;;  %v566_v49 = vld [vmem:[#allocation5 + $0x658] sm:$0xff] }
  0x79   :  { %1459 = vmatpush3.msra.mxu1 %v531_v57  ;;  %1426 = vmatpush3.msra.mxu0 %v498_v63  ;;  %v88_v57 = vld [vmem:[#allocation2 + $0x168] sm:$0xff]  ;;  %v106_v63 = vld [vmem:[#allocation2 + $0x1f8] sm:$0xff] }
  0x7a   :  { %1460 = vmatprep.subr.mxu1 %v546_v62  ;;  %1427 = vmatprep.subr.mxu0 %v513_v4  ;;  %v90_v62 = vld [vmem:[#allocation2 + $0x178] sm:$0xff]  ;;  %v103_v4 = vld [vmem:[#allocation2 + $0x1e0] sm:$0xff]  ;;  %v669_v8 = vsel %vm658_vm0, %v357_v54, %v341_v53  ;;  %v581_v54 = vld [vmem:[#allocation5 + $0x6d0] sm:$0xff] }
  0x7b   :  { %1461 = vmatpush3.msra.mxu1 %v530_v3  ;;  %1428 = vmatpush3.msra.mxu0 %v497_v6  ;;  %v87_v3 = vld [vmem:[#allocation2 + $0x160] sm:$0xff]  ;;  %v667_v6 = vsel %vm658_vm0, %v355_v48, %v339_v47  ;;  %v324_v18 = vadd.f32 %v106_v63, %v90_v62  ;;  %v614_v48 = vld [vmem:[#allocation5 + $0x7d8] sm:$0xff] }
  0x7c   :  { %1462 = vmatprep.subr.mxu1 %v545_v5  ;;  %1429 = vmatprep.subr.mxu0 %v512_v10  ;;  %v57_v5 = vld [vmem:[#allocation2 + $0x70] sm:$0xff]  ;;  %v598_v53 = vld [vmem:[#allocation5 + $0x758] sm:$0xff] }
  0x7d   :  { %1463 = vmatpush3.msra.mxu1 %v529_v9  ;;  %1430 = vmatpush3.msra.mxu0 %v496_v15  ;;  %v73_v9 = vld [vmem:[#allocation2 + $0xf0] sm:$0xff]  ;;  %v310_v15 = vadd.f32 %v104_v58, %v88_v57  ;;  %v325_v34 = vrot.slane %v324_v18, 4 }
  0x7e   :  { %1464 = vmatprep.subr.mxu1 %v544_v14  ;;  %1431 = vmatprep.subr.mxu0 %v511_v20  ;;  %v89_v10 = vld [vmem:[#allocation2 + $0x170] sm:$0xff]  ;;  %v198_v14 = vadd.f32 %v72_v56, %v56_v55  ;;  %v303_v20 = vadd.f32 %v103_v4, %v87_v3  ;;  %v205_v23 = vadd.f32 %v73_v9, %v57_v5  ;;  %v596_v5 = vld [vmem:[#allocation5 + $0x748] sm:$0xff]  ;;  %v611_v9 = vld [vmem:[#allocation5 + $0x7c0] sm:$0xff] }
  0x7f   :  { %1465 = vmatpush3.msra.mxu1 %v528_v19  ;;  %1432 = vmatpush3.msra.mxu0 %v495_v22  ;;  %v191_v19 = vadd.f32 %v71_v1, %v55_v0  ;;  %v585_v22 = vld [vmem:[#allocation5 + $0x6f0] sm:$0xff]  ;;  %v317_v24 = vadd.f32 %v105_v11, %v89_v10  ;;  %v311_v30 = vrot.slane %v310_v15, 4  ;;  %v612_v0 = vld [vmem:[#allocation5 + $0x7c8] sm:$0xff]  ;;  %v563_v10 = vld [vmem:[#allocation5 + $0x640] sm:$0xff] }
  0x80   :  { %1466 = vmatprep.subr.mxu1 %v543_v21  ;;  %1433 = vmatprep.subr.mxu0 %v510_v26  ;;  %v602_v21 = vld [vmem:[#allocation5 + $0x778] sm:$0xff]  ;;  %v569_v26 = vld [vmem:[#allocation5 + $0x670] sm:$0xff]  ;;  %v199_v29 = vrot.slane %v198_v14, 4  ;;  %v304_v36 = vrot.slane %v303_v20, 4  ;;  %v564_v1 = vld [vmem:[#allocation5 + $0x648] sm:$0xff] }
  0x81   :  { %1467 = vmatpush3.msra.mxu1 %v527_v25  ;;  %1434 = vmatpush3.msra.mxu0 %v494_v31  ;;  %v617_v25 = vld [vmem:[#allocation5 + $0x7f0] sm:$0xff]  ;;  %v213_v31 = vrot.slane %v212_v16, 4  ;;  %v192_v35 = vrot.slane %v191_v19, 4  ;;  %v312_v46 = vadd.f32 %v311_v30, %v310_v15  ;;  %v595_v11 = vld [vmem:[#allocation5 + $0x740] sm:$0xff] }
  0x82   :  { %1468 = vmatprep.subr.mxu1 %v542_v27  ;;  %1435 = vmatprep.subr.mxu0 %v509_v33  ;;  %v601_v27 = vld [vmem:[#allocation5 + $0x770] sm:$0xff]  ;;  %v568_v33 = vld [vmem:[#allocation5 + $0x668] sm:$0xff]  ;;  %v305_v52 = vadd.f32 %v304_v36, %v303_v20 }
  0x83   :  { %1469 = vmatpush3.msra.mxu1 %v526_v32  ;;  %1436 = vmatpush3.msra.mxu0 %v493_v38  ;;  %v616_v32 = vld [vmem:[#allocation5 + $0x7e8] sm:$0xff]  ;;  %v583_v38 = vld [vmem:[#allocation5 + $0x6e0] sm:$0xff]  ;;  %v214_v47 = vadd.f32 %v213_v31, %v212_v16  ;;  %v613_v57 = vld [vmem:[#allocation5 + $0x7d0] sm:$0xff]  ;;  %v313_v62 = vrot.slane %v312_v46, 2 }
  0x84   :  { %1470 = vmatprep.subr.mxu1 %v541_v37  ;;  %1437 = vmatprep.subr.mxu0 %v508_v40  ;;  %v600_v37 = vld [vmem:[#allocation5 + $0x768] sm:$0xff]  ;;  %v318_v40 = vrot.slane %v317_v24, 4  ;;  %v565_v58 = vld [vmem:[#allocation5 + $0x650] sm:$0xff]  ;;  %v306_v4 = vrot.slane %v305_v52, 2  ;;  %v610_v16 = vld [vmem:[#allocation5 + $0x7b8] sm:$0xff] }
  0x85   :  { %1471 = vmatpush3.msra.mxu1 %v525_v39  ;;  %1438 = vmatpush3.msra.mxu0 %v492_v42  ;;  %v206_v39 = vrot.slane %v205_v23, 4  ;;  %v567_v42 = vld [vmem:[#allocation5 + $0x660] sm:$0xff]  ;;  %v215_v63 = vrot.slane %v214_v47, 2 }
  0x86   :  { %1472 = vmatprep.subr.mxu1 %v540_v41  ;;  %1439 = vmatprep.subr.mxu0 %v507_v45  ;;  %v615_v41 = vld [vmem:[#allocation5 + $0x7e0] sm:$0xff]  ;;  %v200_v45 = vadd.f32 %v199_v29, %v198_v14  ;;  %v319_v56 = vadd.f32 %v318_v40, %v317_v24  ;;  %v314_v14 = vadd.f32 %v313_v62, %v312_v46 }
  0x87   :  { %1473 = vmatpush3.msra.mxu1 %v524_v44  ;;  %1440 = vmatpush3.msra.mxu0 %v491_v51  ;;  %v582_v44 = vld [vmem:[#allocation5 + $0x6d8] sm:$0xff]  ;;  %v193_v51 = vadd.f32 %v192_v35, %v191_v19  ;;  %v207_v55 = vadd.f32 %v206_v39, %v205_v23  ;;  %v216_v15 = vadd.f32 %v215_v63, %v214_v47  ;;  %v604_v63 = vld [vmem:[#allocation5 + $0x788] sm:$0xff] }
  0x88   :  { %1474 = vmatprep.subr.mxu1 %v539_v50  ;;  %1035 = vmatprep.mubr.f32.mxu0 %v668_v2  ;;  %v326_v50 = vadd.f32 %v325_v34, %v324_v18  ;;  %v201_v61 = vrot.slane %v200_v45, 2  ;;  %v307_v20 = vadd.f32 %v306_v4, %v305_v52  ;;  %v315_v30 = vrot.slane %v314_v14, 1 }
  0x89   :  { %1475 = vmatpush3.msra.mxu1 %v523_v59  ;;  %1036 = vmatmul.mubr.f32.vlgmr.msra.gmra.mxu0 %v667_v6  ;;  %v597_v59 = vld [vmem:[#allocation5 + $0x750] sm:$0xff]  ;;  %v194_v3 = vrot.slane %v193_v51, 2  ;;  %v579_v6 = vld [vmem:[#allocation5 + $0x6c0] sm:$0xff]  ;;  %v217_v31 = vrot.slane %v216_v15, 1 }
  0x8a   :  { %1105 = vmatprep.mubr.f32.mxu1 %v670_v7  ;;  %1479 = vmatprep.subr.mxu0 %v586_v12  ;;  %v327_v2 = vrot.slane %v326_v50, 2  ;;  %v208_v7 = vrot.slane %v207_v55, 2  ;;  %v578_v12 = vld [vmem:[#allocation5 + $0x6b8] sm:$0xff]  ;;  %v308_v36 = vrot.slane %v307_v20, 1  ;;  %v316_v46 = vadd.f32 %v315_v30, %v314_v14 }
  0x8b   :  { %1514 = vmatprep.subr.mxu1 %v618_v13  ;;  %1106 = vmatmul.mubr.f32.vlgmr.msra.gmra.mxu1 %v669_v8  ;;  %v320_v8 = vrot.slane %v319_v56, 2  ;;  %v202_v13 = vadd.f32 %v201_v61, %v200_v45  ;;  %v195_v19 = vadd.f32 %v194_v3, %v193_v51  ;;  %v218_v47 = vadd.f32 %v217_v31, %v216_v15 }
  0x8c   :  { %1480 = vmatpush3.msra.mxu0 %v570_v17  ;;  %1515 = vmatpush3.msra.mxu1 %v602_v21  ;;  %v562_v17 = vld [vmem:[#allocation5 + $0x638] sm:$0xff]  ;;  %v328_v18 = vadd.f32 %v327_v2, %v326_v50  ;;  %v209_v23 = vadd.f32 %v208_v7, %v207_v55  ;;  %v309_v52 = vadd.f32 %v308_v36, %v307_v20  ;;  %v360_v62 = vmul.f32 0.0625, %v316_v46 }
  0x8d   :  { %1481 = vmatprep.subr.mxu0 %v585_v22  ;;  %1516 = vmatprep.subr.mxu1 %v617_v25  ;;  %v594_v21 = vld [vmem:[#allocation5 + $0x738] sm:$0xff]  ;;  %v577_v22 = vld [vmem:[#allocation5 + $0x6b0] sm:$0xff]  ;;  %v321_v24 = vadd.f32 %v320_v8, %v319_v56  ;;  %v203_v29 = vrot.slane %v202_v13, 1  ;;  %v196_v35 = vrot.slane %v195_v19, 1 }
  0x8e   :  { %1482 = vmatpush3.msra.mxu0 %v569_v26  ;;  %1517 = vmatpush3.msra.mxu1 %v601_v27  ;;  %v609_v25 = vld [vmem:[#allocation5 + $0x7b0] sm:$0xff]  ;;  %v329_v34 = vrot.slane %v328_v18, 1  ;;  %v210_v39 = vrot.slane %v209_v23, 1  ;;  %v359_v4 = vmul.f32 0.0625, %v309_v52 }
  0x8f   :  { %1483 = vmatprep.subr.mxu0 %v584_v28  ;;  %1518 = vmatprep.subr.mxu1 %v616_v32  ;;  %v561_v26 = vld [vmem:[#allocation5 + $0x630] sm:$0xff]  ;;  %v576_v28 = vld [vmem:[#allocation5 + $0x6a8] sm:$0xff]  ;;  %v322_v40 = vrot.slane %v321_v24, 1  ;;  %v204_v45 = vadd.f32 %v203_v29, %v202_v13  ;;  %v197_v51 = vadd.f32 %v196_v35, %v195_v19 }
  0x90   :  { %1484 = vmatpush3.msra.mxu0 %v568_v33  ;;  %1519 = vmatpush3.msra.mxu1 %v600_v37  ;;  %v593_v27 = vld [vmem:[#allocation5 + $0x730] sm:$0xff]  ;;  %v608_v32 = vld [vmem:[#allocation5 + $0x7a8] sm:$0xff]  ;;  %v330_v50 = vadd.f32 %v329_v34, %v328_v18  ;;  %v211_v55 = vadd.f32 %v210_v39, %v209_v23 }
  0x91   :  { %1485 = vmatprep.subr.mxu0 %v583_v38  ;;  %1520 = vmatprep.subr.mxu1 %v615_v41  ;;  %v560_v33 = vld [vmem:[#allocation5 + $0x628] sm:$0xff]  ;;  %v575_v38 = vld [vmem:[#allocation5 + $0x6a0] sm:$0xff]  ;;  %v323_v56 = vadd.f32 %v322_v40, %v321_v24  ;;  %v344_v61 = vmul.f32 0.0625, %v204_v45  ;;  %v343_v3 = vmul.f32 0.0625, %v197_v51 }
  0x92   :  { %1486 = vmatpush3.msra.mxu0 %v567_v42  ;;  %1521 = vmatpush3.msra.mxu1 %v599_v43  ;;  %v592_v37 = vld [vmem:[#allocation5 + $0x728] sm:$0xff]  ;;  %v607_v41 = vld [vmem:[#allocation5 + $0x7a0] sm:$0xff]  ;;  %v362_v2 = vmul.f32 0.0625, %v330_v50  ;;  %v345_v7 = vmul.f32 0.0625, %v211_v55 }
  0x93   :  { %1487 = vmatprep.subr.mxu0 %v582_v44  ;;  %1522 = vmatprep.subr.mxu1 %v614_v48  ;;  %v559_v42 = vld [vmem:[#allocation5 + $0x620] sm:$0xff]  ;;  %v574_v44 = vld [vmem:[#allocation5 + $0x698] sm:$0xff]  ;;  %v361_v8 = vmul.f32 0.0625, %v323_v56  ;;  %v671_v14 = vsel %vm658_vm0, %v359_v4, %v343_v3 }
  0x94   :  { %1488 = vmatpush3.msra.mxu0 %v566_v49  ;;  %1523 = vmatpush3.msra.mxu1 %v598_v53  ;;  %v591_v43 = vld [vmem:[#allocation5 + $0x720] sm:$0xff]  ;;  %v606_v48 = vld [vmem:[#allocation5 + $0x798] sm:$0xff] }
  0x95   :  { %1489 = vmatprep.subr.mxu0 %v581_v54  ;;  %1524 = vmatprep.subr.mxu1 %v613_v57  ;;  %v558_v49 = vld [vmem:[#allocation5 + $0x618] sm:$0xff]  ;;  %v573_v54 = vld [vmem:[#allocation5 + $0x690] sm:$0xff]  ;;  %v673_v15 = vsel %vm658_vm0, %v361_v8, %v345_v7 }
  0x96   :  { %1490 = vmatpush3.msra.mxu0 %v565_v58  ;;  %1525 = vmatpush3.msra.mxu1 %v597_v59  ;;  %v590_v53 = vld [vmem:[#allocation5 + $0x718] sm:$0xff]  ;;  %v605_v57 = vld [vmem:[#allocation5 + $0x790] sm:$0xff] }
  0x97   :  { %1491 = vmatprep.subr.mxu0 %v580_v60  ;;  %1526 = vmatprep.subr.mxu1 %v612_v0  ;;  %v557_v58 = vld [vmem:[#allocation5 + $0x610] sm:$0xff]  ;;  %v572_v60 = vld [vmem:[#allocation5 + $0x688] sm:$0xff] }
  0x98   :  { %1492 = vmatpush3.msra.mxu0 %v564_v1  ;;  %1527 = vmatpush3.msra.mxu1 %v596_v5  ;;  %v589_v59 = vld [vmem:[#allocation5 + $0x710] sm:$0xff]  ;;  %v556_v0 = vld [vmem:[#allocation5 + $0x608] sm:$0xff]  ;;  %v346_v1 = vmul.f32 0.0625, %v218_v47 }
  0x99   :  { %1493 = vmatprep.subr.mxu0 %v579_v6  ;;  %1528 = vmatprep.subr.mxu1 %v611_v9  ;;  %v588_v5 = vld [vmem:[#allocation5 + $0x708] sm:$0xff]  ;;  %v571_v6 = vld [vmem:[#allocation5 + $0x680] sm:$0xff] }
  0x9a   :  { %1494 = vmatpush3.msra.mxu0 %v563_v10  ;;  %1529 = vmatpush3.msra.mxu1 %v595_v11  ;;  %v603_v9 = vld [vmem:[#allocation5 + $0x780] sm:$0xff]  ;;  %v672_v11 = vsel %vm658_vm0, %v360_v62, %v344_v61  ;;  %v674_v13 = vsel %vm658_vm0, %v362_v2, %v346_v1 }
  0x9b   :  { %1495 = vmatprep.subr.mxu0 %v578_v12  ;;  %1530 = vmatprep.subr.mxu1 %v610_v16  ;;  %v555_v10 = vld [vmem:[#allocation5 + $0x600] sm:$0xff] }
  0x9c   :  { %1496 = vmatpush3.msra.mxu0 %v562_v17  ;;  %1531 = vmatpush3.msra.mxu1 %v594_v21  ;;  %v587_v12 = vld [vmem:[#allocation5 + $0x700] sm:$0xff] }
  0x9d   :  { %1497 = vmatprep.subr.mxu0 %v577_v22  ;;  %1532 = vmatprep.subr.mxu1 %v609_v25  ;;  %v1268_v21 = vld [vmem:[%s1677_s2] ss:$0 sm:$0xff]  ;;  %s1626_s2 = smov [#allocation7]  }
  0x9e   :  { %1498 = vmatpush3.msra.mxu0 %v561_v26  ;;  %1533 = vmatpush3.msra.mxu1 %v593_v27  ;;  %s1258_s25 = sshll.u32 %s1626_s2, 4  ;;  %s1259_s25 = int_to_ptr.vmem [resolvable:$true] %s1258_s25 }
  0x9f   :  { %1499 = vmatprep.subr.mxu0 %v576_v28  ;;  %1534 = vmatprep.subr.mxu1 %v608_v32  ;;  %s1595_s26 = scalar_lea.vmem %s1259_s25, 32  ;;  %p1600_p11 = scmp.lt.s32.totalorder %s1259_s25, %s1259_s25 }
  0xa0   :  { %1500 = vmatpush3.msra.mxu0 %v560_v33  ;;  %1535 = vmatpush3.msra.mxu1 %v592_v37  ;;  %p1596_p10 = scmp.ne.s32.totalorder %s1259_s25, %s1595_s26  ;;  %p1601_p12 = scmp.lt.s32.totalorder %s1595_s26, %s1595_s26 }
  0xa1   :  { %1501 = vmatprep.subr.mxu0 %v575_v38  ;;  %1536 = vmatprep.subr.mxu1 %v607_v41 }
  0xa2   :  { %1502 = vmatpush3.msra.mxu0 %v559_v42  ;;  %1537 = vmatpush3.msra.mxu1 %v591_v43  ;;  %p1602_p13 = por %p1601_p12, %p1600_p11 }
  0xa3   :  { %1503 = vmatprep.subr.mxu0 %v574_v44  ;;  %1538 = vmatprep.subr.mxu1 %v606_v48 }
  0xa4   :  { %1504 = vmatpush3.msra.mxu0 %v558_v49  ;;  %1539 = vmatpush3.msra.mxu1 %v590_v53  ;;  %p1603_p0 = pnand %p1602_p13, %p1596_p10 }
  0xa5   :  { %1505 = vmatprep.subr.mxu0 %v573_v54  ;;  %1540 = vmatprep.subr.mxu1 %v605_v57 }
  0xa6   :  { %1506 = vmatpush3.msra.mxu0 %v557_v58  ;;  %1541 = vmatpush3.msra.mxu1 %v589_v59 }
  0xa7   :  { %1507 = vmatprep.subr.mxu0 %v572_v60  ;;  %1542 = vmatprep.subr.mxu1 %v604_v63 }
  0xa8   :  { %1508 = vmatpush3.msra.mxu0 %v556_v0  ;;  %1543 = vmatpush3.msra.mxu1 %v588_v5 }
  0xa9   :  { %1509 = vmatprep.subr.mxu0 %v571_v6  ;;  %1544 = vmatprep.subr.mxu1 %v603_v9 }
  0xaa   :  { %1510 = vmatpush3.msra.mxu0 %v555_v10  ;;  %1175 = vmatprep.mubr.f32.mxu0 %v672_v11 }
  0xab   :  { %1545 = vmatpush3.msra.mxu1 %v587_v12  ;;  %1245 = vmatprep.mubr.f32.mxu1 %v674_v13 }
  0xac   :  { %1176 = vmatmul.mubr.f32.vlgmr.msra.gmra.mxu0 %v671_v14  ;;  %1246 = vmatmul.mubr.f32.vlgmr.msra.gmra.mxu1 %v673_v15 }
 0x105   :  { %v1301_v16 = vpop.f32.mrf.mxu0 }
 0x107   :  { %v1302_v18 = vpop.f32.mrf.mxu0 }
 0x108   :  { %v1303_v20 = vadd.f32 %v1302_v18, %v1301_v16 }
 0x109   :  { %v1336_v17 = vpop.f32.mrf.mxu1 }
 0x10a   :  { %v758_v25 = vadd.f32 %v1303_v20, %v1268_v21 }
 0x10b   :  { %v1337_v22 = vpop.f32.mrf.mxu1 }
 0x10c   :  { %v1338_v26 = vadd.f32 %v1337_v22, %v1336_v17 }
 0x10e   :  { %v828_v30 = vadd.f32 %v1338_v26, %v758_v25 }
 0x126   :  { %v1371_v19 = vpop.f32.mrf.mxu0 }
 0x128   :  { %v1372_v24 = vpop.f32.mrf.mxu0 }
 0x129   :  { %v1373_v28 = vadd.f32 %v1372_v24, %v1371_v19 }
 0x12a   :  { %v1406_v23 = vpop.f32.mrf.mxu1 }
 0x12b   :  { %v898_v33 = vadd.f32 %v1373_v28, %v828_v30 }
 0x12c   :  { %v1407_v29 = vpop.f32.mrf.mxu1 }
 0x12d   :  { %v1408_v34 = vadd.f32 %v1407_v29, %v1406_v23 }
 0x12f   :  { %v968_v37 = vadd.f32 %v1408_v34, %v898_v33 }
 0x149   :  { %v1441_v27 = vpop.f32.mrf.mxu0 }
 0x14b   :  { %v1476_v31 = vpop.f32.mrf.mxu1  ;;  %v1442_v32 = vpop.f32.mrf.mxu0 }
 0x14c   :  { %v1443_v35 = vadd.f32 %v1442_v32, %v1441_v27 }
 0x14d   :  { %v1477_v36 = vpop.f32.mrf.mxu1 }
 0x14e   :  { %v1038_v38 = vadd.f32 %v1443_v35, %v968_v37  ;;  %v1478_v39 = vadd.f32 %v1477_v36, %v1476_v31 }
 0x150   :  { %v1108_v43 = vadd.f32 %v1478_v39, %v1038_v38 }
 0x16c   :  { %v1511_v40 = vpop.f32.mrf.mxu0  ;;  %v1546_v41 = vpop.f32.mrf.mxu1 }
 0x16e   :  { %v1512_v42 = vpop.f32.mrf.mxu0  ;;  %v1547_v45 = vpop.f32.mrf.mxu1 }
 0x16f   :  { %v1513_v44 = vadd.f32 %v1512_v42, %v1511_v40  ;;  %v1548_v47 = vadd.f32 %v1547_v45, %v1546_v41 }
 0x171   :  { %v1178_v46 = vadd.f32 %v1513_v44, %v1108_v43 }
 0x173   :  { %v1248_v48 = vadd.f32 %v1548_v47, %v1178_v46 }
 0x175   :  { %1251 = vst [vmem:[#allocation7] sm:$0x3] %v1248_v48 }
 0x176   :  { %1606 = shalt.err (!%p1603_p0)
}
 0x177   :  { %1261 = dma.vmem_to_hbm [thread:$0]  %s1259_s25, 32, %s1678_s3, [#allocation4]  }
 0x178   :  { %1619 = dma.done.wait [#allocation4], 32  }
 0x179   :  { %1620 = vsyncadd [#allocation4], 4294967264 }
 0x17a   :  { %1265 = vsyncpa [#allocation3], 1 }
 0x17b   :  { %1266 = vsyncpa [#allocation6], 1 }
 0x17c   :  { %1267 = vsyncpa [#allocation4], 1 }

</bundles_post_ra>
